<compile_context>
chip_gen: v5e
topology: v5e:2x2
jax: 0.10.0
libtpu: 0.0.40
codegen_flags: <defaults>
</compile_context>

<pallas_src>
import functools
import operator

import jax
import jax.numpy as jnp
from jax.experimental import pallas as pl
from jax.experimental.pallas import tpu as pltpu


# Below this N the direct VPU/XLU path beats the MXU formulation (review rec.).
_SMALL_N = 8


def _euclid_loss_small_kernel(c_ref, d_ref, o_ref):
    """Direct-difference path for tiny N: no MXU, no cancellation."""
    # c_ref, d_ref: (N, K) f32 in VMEM; o_ref: (1, 1) f32.
    c = c_ref[...]
    n = c.shape[0]

    # Unrolled j-loop (N is small & static): for each D row, broadcast-subtract
    # against all C rows, one lane reduce, one EUP sqrt, accumulate.
    acc = jnp.zeros((n, 1), dtype=jnp.float32)
    for j in range(n):
        dj = d_ref[pl.ds(j, 1), :]                                # (1, K)
        diff = c - dj                                             # (N, K) VPU
        acc = acc + jnp.sqrt(jnp.sum(diff * diff, axis=-1, keepdims=True))

    # Single final cross-lane/sublane reduce + single (1, 1) store.
    o_ref[...] = jnp.sum(acc, keepdims=True)


def _euclid_loss_gram_kernel(c_ref, d_ref, o_ref):
    """Gram-matrix path for larger (but still VMEM-resident) N.

    Single fused MXU call:
      lhs = [C; 1]   (N+1, K)
      rhs = [D; D*D] (2N, K)
      prod = lhs @ rhs^T  ->  prod[:N, :N]  = G = C @ D^T
                              prod[N, N:]   = row of ||D[j]||^2
    """
    c = c_ref[...]
    d = d_ref[...]
    n, k = c.shape

    ones_row = jnp.ones((1, k), dtype=jnp.float32)
    lhs = jnp.concatenate([c, ones_row], axis=0)                  # (N+1, K)
    rhs = jnp.concatenate([d, d * d], axis=0)                     # (2N, K)

    # One NT matmul contracting K; explicit HIGHEST precision (no native f32
    # MXU on any TPU generation; default lowering can be a single bf16 pass).
    prod = jax.lax.dot_general(
        lhs, rhs, (((1,), (1,)), ((), ())),
        preferred_element_type=jnp.float32,
        precision=jax.lax.Precision.HIGHEST)                      # (N+1, 2N)

    g = prod[:n, :n]                                              # (N, N)
    d_n2_row = prod[n:n + 1, n:]                                  # (1, N)

    # Row squared norms of C: one lane reduce.
    c_n2 = jnp.sum(c * c, axis=-1, keepdims=True)                 # (N, 1)

    # Pairwise squared Frobenius distances, clamped for numerical safety.
    # (Forward-only; a VJP would need an epsilon before sqrt at zero distance.)
    sq = jnp.maximum(c_n2 + d_n2_row - 2.0 * g, 0.0)              # (N, N)
    o_ref[...] = jnp.sum(jnp.sqrt(sq), keepdims=True)


def euclidean_distance_loss(C, D):
    assert C.shape == D.shape, "Input tensors must have the same shape"
    n = C.shape[0]
    k = functools.reduce(operator.mul, C.shape[1:], 1)

    # Flatten each matrix into a lane-dense row.
    c2 = jnp.asarray(C).reshape(n, k)
    d2 = jnp.asarray(D).reshape(n, k)

    # Cast only when needed (avoid an extra HBM pass for the common f32 case).
    if c2.dtype != jnp.float32:
        c2 = c2.astype(jnp.float32)
    if d2.dtype != jnp.float32:
        d2 = d2.astype(jnp.float32)

    # Zero-pad K up to a multiple of 128 only if required: zeros contribute
    # nothing to norms or inner products. (The shipped K=256 skips this.)
    k_pad = ((k + 127) // 128) * 128
    if k_pad != k:
        c2 = jnp.pad(c2, ((0, 0), (0, k_pad - k)))
        d2 = jnp.pad(d2, ((0, 0), (0, k_pad - k)))

    kernel = _euclid_loss_small_kernel if n <= _SMALL_N else _euclid_loss_gram_kernel

    out = pl.pallas_call(
        kernel,
        out_shape=jax.ShapeDtypeStruct((1, 1), jnp.float32),
        in_specs=[
            pl.BlockSpec(memory_space=pltpu.MemorySpace.VMEM),
            pl.BlockSpec(memory_space=pltpu.MemorySpace.VMEM),
        ],
        out_specs=pl.BlockSpec(memory_space=pltpu.MemorySpace.VMEM),
        compiler_params=pltpu.CompilerParams(
            # Let the wrapper-side reshape fuse into the kernel operands
            # instead of materializing a standalone relayout copy in HBM.
            allow_input_fusion=[True, True]),
    )(c2, d2)

    # 1/N^2 averaging in the wrapper (free scalar op in XLA).
    return out[0, 0] / float(n * n)


def _reference(C, D):
    n = C.shape[0]
    total = jnp.float32(0.0)
    for i in range(n):
        for j in range(n):
            total = total + jnp.sqrt(jnp.sum((C[i] - D[j]) ** 2))
    return total / (n ** 2)


if __name__ == "__main__":
    key = jax.random.PRNGKey(0)
    kc, kd = jax.random.split(key)
    # Stack of 4 matrices of shape 16x16 (consistent with the module's usage).
    N, H, W = 4, 16, 16
    C = jax.random.normal(kc, (N, H, W), dtype=jnp.float32)
    D = jax.random.normal(kd, (N, H, W), dtype=jnp.float32)

    out = jax.block_until_ready(euclidean_distance_loss(C, D))
    ref = jax.block_until_ready(_reference(C, D))
    assert jnp.allclose(out, ref, rtol=1e-5, atol=1e-5), (out, ref)

    print("KERNEL_OK")
</pallas_src>

<mosaic_0001>
module attributes {stable_mosaic.version = 11 : i64} {
  func.func @_euclid_loss_small_kernel(%arg0: memref<4x256xf32, #tpu.memory_space<vmem>>, %arg1: memref<4x256xf32, #tpu.memory_space<vmem>>, %arg2: memref<1x1xf32, #tpu.memory_space<vmem>>) attributes {dimension_semantics = [], scalar_prefetch = 0 : i64, scratch_operands = 0 : i64, tpu.core_type = #tpu.core_type<tc>} {
    %c0 = arith.constant 0 : index
    %c0_0 = arith.constant 0 : index
    %0 = vector.load %arg0[%c0, %c0_0] : memref<4x256xf32, #tpu.memory_space<vmem>>, vector<4x256xf32>
    %cst = arith.constant 0.000000e+00 : f32
    %1 = vector.broadcast %cst : f32 to vector<4x1xf32>
    %c0_1 = arith.constant 0 : index
    %c0_2 = arith.constant 0 : index
    %2 = vector.load %arg1[%c0_1, %c0_2] : memref<4x256xf32, #tpu.memory_space<vmem>>, vector<1x256xf32>
    %3 = vector.broadcast %2 : vector<1x256xf32> to vector<4x256xf32>
    %4 = arith.subf %0, %3 : vector<4x256xf32>
    %5 = arith.mulf %4, %4 : vector<4x256xf32>
    %cst_3 = arith.constant dense<0.000000e+00> : vector<4xf32>
    %6 = vector.multi_reduction <add>, %5, %cst_3 [1] : vector<4x256xf32> to vector<4xf32>
    %7 = vector.shape_cast %6 : vector<4xf32> to vector<4x1xf32>
    %8 = math.sqrt %7 : vector<4x1xf32>
    %9 = arith.addf %1, %8 : vector<4x1xf32>
    %c1 = arith.constant 1 : index
    %c0_4 = arith.constant 0 : index
    %10 = vector.load %arg1[%c1, %c0_4] : memref<4x256xf32, #tpu.memory_space<vmem>>, vector<1x256xf32>
    %11 = vector.broadcast %10 : vector<1x256xf32> to vector<4x256xf32>
    %12 = arith.subf %0, %11 : vector<4x256xf32>
    %13 = arith.mulf %12, %12 : vector<4x256xf32>
    %cst_5 = arith.constant dense<0.000000e+00> : vector<4xf32>
    %14 = vector.multi_reduction <add>, %13, %cst_5 [1] : vector<4x256xf32> to vector<4xf32>
    %15 = vector.shape_cast %14 : vector<4xf32> to vector<4x1xf32>
    %16 = math.sqrt %15 : vector<4x1xf32>
    %17 = arith.addf %9, %16 : vector<4x1xf32>
    %c2 = arith.constant 2 : index
    %c0_6 = arith.constant 0 : index
    %18 = vector.load %arg1[%c2, %c0_6] : memref<4x256xf32, #tpu.memory_space<vmem>>, vector<1x256xf32>
    %19 = vector.broadcast %18 : vector<1x256xf32> to vector<4x256xf32>
    %20 = arith.subf %0, %19 : vector<4x256xf32>
    %21 = arith.mulf %20, %20 : vector<4x256xf32>
    %cst_7 = arith.constant dense<0.000000e+00> : vector<4xf32>
    %22 = vector.multi_reduction <add>, %21, %cst_7 [1] : vector<4x256xf32> to vector<4xf32>
    %23 = vector.shape_cast %22 : vector<4xf32> to vector<4x1xf32>
    %24 = math.sqrt %23 : vector<4x1xf32>
    %25 = arith.addf %17, %24 : vector<4x1xf32>
    %c3 = arith.constant 3 : index
    %c0_8 = arith.constant 0 : index
    %26 = vector.load %arg1[%c3, %c0_8] : memref<4x256xf32, #tpu.memory_space<vmem>>, vector<1x256xf32>
    %27 = vector.broadcast %26 : vector<1x256xf32> to vector<4x256xf32>
    %28 = arith.subf %0, %27 : vector<4x256xf32>
    %29 = arith.mulf %28, %28 : vector<4x256xf32>
    %cst_9 = arith.constant dense<0.000000e+00> : vector<4xf32>
    %30 = vector.multi_reduction <add>, %29, %cst_9 [1] : vector<4x256xf32> to vector<4xf32>
    %31 = vector.shape_cast %30 : vector<4xf32> to vector<4x1xf32>
    %32 = math.sqrt %31 : vector<4x1xf32>
    %33 = arith.addf %25, %32 : vector<4x1xf32>
    %34 = vector.shape_cast %33 : vector<4x1xf32> to vector<1x4x1xf32>
    %cst_10 = arith.constant dense<0.000000e+00> : vector<1xf32>
    %35 = vector.multi_reduction <add>, %34, %cst_10 [1, 2] : vector<1x4x1xf32> to vector<1xf32>
    %36 = vector.shape_cast %35 : vector<1xf32> to vector<1x1x1xf32>
    %37 = vector.extract %36[0, 0, 0] : f32 from vector<1x1x1xf32>
    %38 = vector.broadcast %37 : f32 to vector<1x1xf32>
    %c0_11 = arith.constant 0 : index
    %c0_12 = arith.constant 0 : index
    %39 = vector.load %arg2[%c0_11, %c0_12] : memref<1x1xf32, #tpu.memory_space<vmem>>, vector<1x1xf32>
    tpu.vector_store %arg2[%c0_11, %c0_12], %38 {strides = array<i32>} : memref<1x1xf32, #tpu.memory_space<vmem>>, vector<1x1xf32>,
    return
  }
}

</mosaic_0001>

<bundles_post_ra>
// kernel: tpu_custom_call.1
= control target key start
LH: loop header
LB: loop body
LE: loop exit
PB: predicated region body
PF: predicated region fallthrough
CT: control target
= control target key end

     0   :  { %7 = vsyncpa [#allocation3], 0  ;;  %s339_s0 = inlined_call_operand.hbm [shape: f32[4,256], index: 0, kind: input, shape index: {}]   ;;  %s340_s1 = inlined_call_operand.hbm [shape: f32[4,256], index: 1, kind: input, shape index: {}]   ;;  %s341_s2 = inlined_call_operand.hbm [shape: f32[1,1], index: 2, kind: output, shape index: {}]  }
   0x1   :  { %8 = vsyncpa [#allocation6], 0 }
   0x2   :  { %9 = vsyncpa [#allocation4], 0  ;;  %s15_s11 = sshll.u32 %s339_s0, 4  ;;  %s300_s12 = smov [#allocation2]   ;;  %s16_s11 = int_to_ptr.hbm [resolvable:$true] %s15_s11 }
   0x3   :  { %s17_s13 = sshll.u32 %s300_s12, 4  ;;  %s26_s16 = sshll.u32 %s340_s1, 4  ;;  %s18_s13 = int_to_ptr.vmem [resolvable:$true] %s17_s13  ;;  %s27_s16 = int_to_ptr.hbm [resolvable:$true] %s26_s16 }
   0x4   :  { %20 = dma.hbm_to_vmem [thread:$0]  %s16_s11, 128, %s18_s13, [#allocation3]  }
   0x5   :  { %s301_s17 = smov [#allocation5]  }
   0x6   :  { %s28_s18 = sshll.u32 %s301_s17, 4  ;;  %s29_s18 = int_to_ptr.vmem [resolvable:$true] %s28_s18 }
   0x7   :  { %31 = dma.hbm_to_vmem [thread:$0]  %s27_s16, 128, %s29_s18, [#allocation6]  }
   0x8   :  { %294 = dma.done.wait [#allocation3], 128  }
   0x9   :  { %295 = vsyncadd [#allocation3], 4294967168 }
   0xa   :  { %296 = dma.done.wait [#allocation6], 128  }
   0xb   :  { %297 = vsyncadd [#allocation6], 4294967168  ;;  %v41_v0 = vld [vmem:[#allocation5] ss:$4 sm:$0x3]  ;;  %vm46_vm0 = vcmask 1043456  }
   0xc   :  { %v43_v1 = vperm.slane %v41_v0, 0  ;;  %v44_v2 = vperm.slane %v41_v0, 1  ;;  %v76_v3 = vld [vmem:[#allocation5 + $0x1] ss:$4 sm:$0x3]  ;;  %v40_v5 = vld [vmem:[#allocation2] sm:$0xff] }
   0xd   :  { %v79_v4 = vperm.slane %v76_v3, 1  ;;  %v78_v7 = vperm.slane %v76_v3, 0  ;;  %v110_v9 = vld [vmem:[#allocation5 + $0x2] ss:$4 sm:$0x3]  ;;  %vm177_vm9 = vcmask 3072  }
   0xe   :  { %v45_v6 = vrot.slane %v44_v2, 4  ;;  %v113_v13 = vperm.slane %v110_v9, 1  ;;  %v112_v16 = vperm.slane %v110_v9, 0  ;;  %v144_v18 = vld [vmem:[#allocation5 + $0x3] ss:$4 sm:$0x3] }
   0xf   :  { %v80_v8 = vrot.slane %v79_v4, 4  ;;  %v147_v21 = vperm.slane %v144_v18, 1  ;;  %v146_v28 = vperm.slane %v144_v18, 0  ;;  %s302_s0 = smov [#allocation7]   ;;  %s198_s21 = sshll.u32 %s341_s2, 4  ;;  %vm189_vm10 = vcmask 0   ;;  %s199_s21 = int_to_ptr.hbm [resolvable:$true] %s198_s21 }
  0x10   :  { %v47_v10 = vsel %vm46_vm0, %v43_v1, %v45_v6  ;;  %v114_v17 = vrot.slane %v113_v13, 4  ;;  %s196_s1 = sshll.u32 %s302_s0, 4  ;;  %s197_s1 = int_to_ptr.vmem [resolvable:$true] %s196_s1 }
  0x11   :  { %v49_v11 = vsub.f32 %v40_v5, %v47_v10  ;;  %v81_v12 = vsel %vm46_vm0, %v78_v7, %v80_v8  ;;  %v148_v29 = vrot.slane %v147_v21, 4 }
  0x12   :  { %v83_v15 = vsub.f32 %v40_v5, %v81_v12  ;;  %v115_v20 = vsel %vm46_vm0, %v112_v16, %v114_v17 }
  0x13   :  { %v50_v14 = vmul.f32 %v49_v11, %v49_v11  ;;  %v117_v26 = vsub.f32 %v40_v5, %v115_v20  ;;  %v149_v31 = vsel %vm46_vm0, %v146_v28, %v148_v29 }
  0x14   :  { %v84_v19 = vmul.f32 %v83_v15, %v83_v15  ;;  %v151_v34 = vsub.f32 %v40_v5, %v149_v31 }
  0x15   :  { %52 = vst [vmem:[#allocation1] ss:$2 sm:$0xff] %v50_v14  ;;  %v118_v30 = vmul.f32 %v117_v26, %v117_v26 }
  0x16   :  { %v152_v38 = vmul.f32 %v151_v34, %v151_v34 }
  0x1c   :  { %v53_v22 = vld.sshfl [vmem:[#allocation1] sm:$0xff pattern:$0x75316420]  ;;  %v54_v23 = vld.sshfl [vmem:[#allocation1 + $0x8] sm:$0xff pattern:$0x75316420] }
  0x1d   :  { %v57_v24 = vsel %vm46_vm0, %v53_v22, 0.0  ;;  %v58_v25 = vsel %vm46_vm0, %v54_v23, 0.0  ;;  %86 = vst [vmem:[#allocation1] ss:$2 sm:$0xff] %v84_v19 }
  0x1e   :  { %v59_v27 = vadd.f32 %v58_v25, %v57_v24 }
  0x20   :  { %60 = vadd.xlane.f32.xlu0 %v59_v27 }
  0x24   :  { %v87_v32 = vld.sshfl [vmem:[#allocation1] sm:$0xff pattern:$0x75316420]  ;;  %v88_v33 = vld.sshfl [vmem:[#allocation1 + $0x8] sm:$0xff pattern:$0x75316420] }
  0x25   :  { %v91_v35 = vsel %vm46_vm0, %v87_v32, 0.0  ;;  %v92_v36 = vsel %vm46_vm0, %v88_v33, 0.0  ;;  %120 = vst [vmem:[#allocation1] ss:$2 sm:$0xff] %v118_v30 }
  0x26   :  { %v93_v37 = vadd.f32 %v92_v36, %v91_v35 }
  0x28   :  { %94 = vadd.xlane.f32.xlu0 %v93_v37 }
  0x2c   :  { %v121_v39 = vld.sshfl [vmem:[#allocation1] sm:$0xff pattern:$0x75316420]  ;;  %v122_v40 = vld.sshfl [vmem:[#allocation1 + $0x8] sm:$0xff pattern:$0x75316420] }
  0x2d   :  { %v125_v41 = vsel %vm46_vm0, %v121_v39, 0.0  ;;  %v126_v42 = vsel %vm46_vm0, %v122_v40, 0.0  ;;  %154 = vst [vmem:[#allocation1] ss:$2 sm:$0xff] %v152_v38 }
  0x2e   :  { %v127_v43 = vadd.f32 %v126_v42, %v125_v41 }
  0x30   :  { %128 = vadd.xlane.f32.xlu1 %v127_v43 }
  0x34   :  { %v155_v44 = vld.sshfl [vmem:[#allocation1] sm:$0xff pattern:$0x75316420]  ;;  %v156_v45 = vld.sshfl [vmem:[#allocation1 + $0x8] sm:$0xff pattern:$0x75316420] }
  0x35   :  { %v159_v46 = vsel %vm46_vm0, %v155_v44, 0.0  ;;  %v160_v47 = vsel %vm46_vm0, %v156_v45, 0.0 }
  0x36   :  { %v161_v48 = vadd.f32 %v160_v47, %v159_v46 }
  0x38   :  { %162 = vadd.xlane.f32.xlu1 %v161_v48 }
  0x93   :  { %v61_v49 = vpop.xlane.xlu0 %60 }
  0x94   :  { %214 = vrsqrt.f32 %v61_v49  ;;  %vm69_vm2 = vcmp.eq.f32.partialorder %v61_v49, inf  ;;  %v72_v19 = vand.u32 2147483648, %v61_v49  ;;  %vm71_vm5 = vcmp.eq.f32.partialorder %v61_v49, 0.0 }
  0x9a   :  { %v215_v51 = vpop.eup %214 }
  0x9b   :  { %v95_v50 = vpop.xlane.xlu0 %94  ;;  %v63_v52 = vmul.f32 %v215_v51, %v61_v49 }
  0x9c   :  { %216 = vrsqrt.f32 %v95_v50  ;;  %vm103_vm1 = vcmp.eq.f32.partialorder %v95_v50, inf  ;;  %v106_v15 = vand.u32 2147483648, %v95_v50  ;;  %vm105_vm4 = vcmp.eq.f32.partialorder %v95_v50, 0.0 }
  0x9d   :  { %v64_v56 = vmul.f32 %v215_v51, %v63_v52 }
  0x9f   :  { %v65_v59 = vmul.f32 0.5, %v64_v56 }
  0xa1   :  { %v66_v0 = vsub.f32 1.5, %v65_v59 }
  0xa2   :  { %v217_v53 = vpop.eup %216 }
  0xa3   :  { %v97_v54 = vmul.f32 %v217_v53, %v95_v50  ;;  %v129_v55 = vpop.xlane.xlu1 %128  ;;  %v67_v4 = vmul.f32 %v215_v51, %v66_v0 }
  0xa4   :  { %218 = vrsqrt.f32 %v129_v55  ;;  %vm137_vm3 = vcmp.eq.f32.partialorder %v129_v55, inf  ;;  %v140_v21 = vand.u32 2147483648, %v129_v55  ;;  %vm139_vm6 = vcmp.eq.f32.partialorder %v129_v55, 0.0 }
  0xa5   :  { %v98_v57 = vmul.f32 %v217_v53, %v97_v54  ;;  %v68_v11 = vmul.f32 %v67_v4, %v61_v49 }
  0xa7   :  { %v99_v58 = vmul.f32 0.5, %v98_v57  ;;  %v70_v16 = vsel %vm69_vm2, %v61_v49, %v68_v11 }
  0xa8   :  { %v73_v23 = vsel %vm71_vm5, %v72_v19, %v70_v16 }
  0xa9   :  { %v100_v61 = vsub.f32 1.5, %v99_v58 }
  0xaa   :  { %v219_v60 = vpop.eup %218 }
  0xab   :  { %v131_v62 = vmul.f32 %v219_v60, %v129_v55  ;;  %v163_v63 = vpop.xlane.xlu1 %162  ;;  %v101_v2 = vmul.f32 %v217_v53, %v100_v61 }
  0xac   :  { %220 = vrsqrt.f32 %v163_v63  ;;  %vm171_vm7 = vcmp.eq.f32.partialorder %v163_v63, inf  ;;  %v174_v27 = vand.u32 2147483648, %v163_v63  ;;  %vm173_vm8 = vcmp.eq.f32.partialorder %v163_v63, 0.0 }
  0xad   :  { %v132_v1 = vmul.f32 %v219_v60, %v131_v62  ;;  %v102_v7 = vmul.f32 %v101_v2, %v95_v50 }
  0xaf   :  { %v133_v3 = vmul.f32 0.5, %v132_v1  ;;  %v104_v13 = vsel %vm103_vm1, %v95_v50, %v102_v7 }
  0xb0   :  { %v107_v20 = vsel %vm105_vm4, %v106_v15, %v104_v13 }
  0xb1   :  { %v134_v5 = vsub.f32 1.5, %v133_v3  ;;  %v108_v25 = vadd.f32 %v107_v20, %v73_v23 }
  0xb2   :  { %v221_v6 = vpop.eup %220 }
  0xb3   :  { %v165_v8 = vmul.f32 %v221_v6, %v163_v63  ;;  %v135_v9 = vmul.f32 %v219_v60, %v134_v5 }
  0xb5   :  { %v166_v10 = vmul.f32 %v221_v6, %v165_v8  ;;  %v136_v12 = vmul.f32 %v135_v9, %v129_v55 }
  0xb7   :  { %v167_v14 = vmul.f32 0.5, %v166_v10  ;;  %v138_v17 = vsel %vm137_vm3, %v129_v55, %v136_v12 }
  0xb8   :  { %v141_v24 = vsel %vm139_vm6, %v140_v21, %v138_v17 }
  0xb9   :  { %v168_v18 = vsub.f32 1.5, %v167_v14  ;;  %v142_v28 = vadd.f32 %v141_v24, %v108_v25 }
  0xbb   :  { %v169_v22 = vmul.f32 %v221_v6, %v168_v18 }
  0xbd   :  { %v170_v26 = vmul.f32 %v169_v22, %v163_v63 }
  0xbf   :  { %v172_v29 = vsel %vm171_vm7, %v163_v63, %v170_v26 }
  0xc0   :  { %v175_v30 = vsel %vm173_vm8, %v174_v27, %v172_v29 }
  0xc1   :  { %v176_v31 = vadd.f32 %v175_v30, %v142_v28 }
  0xc3   :  { %v178_v32 = vsel %vm177_vm9, %v176_v31, 0.0 }
  0xc4   :  { %179 = vadd.xlane.f32.xlu2 %v178_v32 }
 0x137   :  { %v180_v33 = vpop.xlane.xlu2 %179 }
 0x138   :  { %v181_v34 = vrot.slane %v180_v33, 4 }
 0x13a   :  { %v182_v35 = vadd.f32 %v181_v34, %v180_v33 }
 0x13c   :  { %v183_v36 = vrot.slane %v182_v35, 2 }
 0x13e   :  { %v184_v37 = vadd.f32 %v183_v36, %v182_v35 }
 0x140   :  { %v185_v38 = vrot.slane %v184_v37, 1 }
 0x142   :  { %v186_v39 = vadd.f32 %v185_v38, %v184_v37 }
 0x144   :  { %209 = vpush %v186_v39 }
 0x175   :  { %s210_s22 = spop %209 }
 0x176   :  { %v188_v40 = vstv %s210_s22 }
 0x177   :  { %190 = vst.msk [vmem:[#allocation7] sm:$0x1] %vm189_vm10, %v188_v40 }
 0x178   :  { %201 = dma.vmem_to_hbm [thread:$0]  %s197_s1, 16, %s199_s21, [#allocation4]  }
 0x179   :  { %298 = dma.done.wait [#allocation4], 16  }
 0x17a   :  { %299 = vsyncadd [#allocation4], 4294967280 }
 0x17b   :  { %206 = vsyncpa [#allocation3], 1 }
 0x17c   :  { %207 = vsyncpa [#allocation6], 1 }
 0x17d   :  { %208 = vsyncpa [#allocation4], 1 }

</bundles_post_ra>
